<compile_context>
chip_gen: v7x
topology: tpu7x:2x2x1
jax: 0.10.0
libtpu: 0.0.40
codegen_flags: <defaults>
</compile_context>

<pallas_src>
import jax
import jax.numpy as jnp
from jax import lax
from jax.experimental import pallas as pl
from jax.experimental.pallas import tpu as pltpu

_NEG = -1e30  # vocab-padding logit: exp(-1e30 - m) == 0, never the row max


def _round_up(x: int, m: int) -> int:
    return (x + m - 1) // m * m


def _make_kernel(B: int, TB: int, S: int):
    def kernel(out_ref, tgt_ref, loss_ref, match_ref):
        x = out_ref[...].astype(jnp.float32)          # (TB, S, Vp)
        t = tgt_ref[...]                              # (TB, S) int32

        # Row-wise softmax pieces: single full-tile exp for the denominator.
        m = jnp.max(x, axis=-1, keepdims=True)                  # (TB, S, 1)
        s = jnp.sum(jnp.exp(x - m), axis=-1, keepdims=True)     # (TB, S, 1)

        # Gather the target logit (exactly one lane matches per row).
        iota = lax.broadcasted_iota(jnp.int32, x.shape, 2)       # (TB, S, Vp)
        x_t = jnp.sum(jnp.where(iota == t[:, :, None], x, 0.0),
                      axis=-1, keepdims=True)                    # (TB, S, 1)

        # Reference parity: loss_token = -log(softmax[target] + 1e-10),
        # but computed per-row only (S elements, not S*V).
        p_t = jnp.exp(x_t - m) / s                               # (TB, S, 1)
        logp_t = jnp.log(p_t + 1e-10)                            # (TB, S, 1)

        # Mask batch-padding rows (global batch index >= B).
        b0 = pl.program_id(0) * TB
        bidx = b0 + lax.broadcasted_iota(jnp.int32, (TB, 1), 0)  # (TB, 1)
        valid = (bidx < B).astype(jnp.float32)                   # (TB, 1)

        # Per-sequence summed NLL.
        seq_loss = -jnp.sum(logp_t, axis=1)                      # (TB, 1)
        loss_ref[...] = seq_loss * valid

        # Exact match: target logit is the row max (reuses m; no argmax).
        # TODO(synk): exact float ties at the max count as correct here,
        # whereas torch.argmax picks the first index.
        correct = (x_t >= m).astype(jnp.float32)                 # (TB, S, 1)
        exact = (jnp.sum(correct, axis=1) > (S - 0.5)).astype(jnp.float32)
        match_ref[...] = exact * valid                           # (TB, 1)

    return kernel


def parser_loss(outputs: jax.Array, target: jax.Array):
    """Returns (loss, match_rate) with the same semantics as ParserLoss.forward."""
    B, S, V = outputs.shape
    outputs = outputs.astype(jnp.float32)
    target = target.astype(jnp.int32)

    # Lane-dense vocab axis.
    Vp = _round_up(max(V, 1), 128)

    # Batch-tile size: biggest TB whose (double-buffered) block stays within a
    # modest VMEM budget -> safe on v5e (16 MiB scoped default), v6e/v7x (32 MiB).
    per_seq_bytes = S * Vp * 4
    budget = 4 * 1024 * 1024
    tb_cap = max(1, budget // per_seq_bytes)
    if B <= tb_cap:
        TB, NB = B, 1
    else:
        TB = max(8, (tb_cap // 8) * 8)   # multiple of 8 -> legal (TB, S) block
        NB = pl.cdiv(B, TB)
    Bp = TB * NB
    # TODO(synk): for very large vocab (single sequence > budget) the vocab axis
    # should additionally be tiled with an online max/sum; not needed here.

    x = outputs
    if Vp != V:
        x = jnp.pad(x, ((0, 0), (0, 0), (0, Vp - V)), constant_values=_NEG)
    tgt = target
    if Bp != B:
        x = jnp.pad(x, ((0, Bp - B), (0, 0), (0, 0)))
        tgt = jnp.pad(tgt, ((0, Bp - B), (0, 0)))

    block_bytes = TB * S * Vp * 4
    vmem_limit = int(max(4 * block_bytes + (1 << 20), 16 * 1024 * 1024))

    loss_parts, match_parts = pl.pallas_call(
        _make_kernel(B, TB, S),
        out_shape=(
            jax.ShapeDtypeStruct((Bp, 1), jnp.float32),   # per-sequence loss
            jax.ShapeDtypeStruct((Bp, 1), jnp.float32),   # per-sequence match
        ),
        grid_spec=pltpu.PrefetchScalarGridSpec(
            num_scalar_prefetch=0,
            grid=(NB,),
            in_specs=[
                pl.BlockSpec((TB, S, Vp), lambda b: (b, 0, 0)),
                pl.BlockSpec((TB, S), lambda b: (b, 0)),
            ],
            out_specs=(
                pl.BlockSpec((TB, 1), lambda b: (b, 0)),
                pl.BlockSpec((TB, 1), lambda b: (b, 0)),
            ),
        ),
        compiler_params=pltpu.CompilerParams(
            dimension_semantics=("parallel",),   # no cross-step deps -> megacore OK
            vmem_limit_bytes=vmem_limit,
        ),
    )(x, tgt)

    loss = jnp.sum(loss_parts) / B
    match_rate = jnp.sum(match_parts) / B
    return loss, match_rate


def _reference(outputs, target):
    # pure-JAX reference mirroring the PyTorch module
    B = outputs.shape[0]
    V = outputs.shape[-1]
    p = jax.nn.softmax(outputs, axis=-1)
    oh = jax.nn.one_hot(target, V, dtype=jnp.float32)
    loss = -jnp.sum(oh * jnp.log(p + 1e-10)) / B
    pred = jnp.argmax(p, axis=-1)
    exact = jnp.all(pred == target, axis=1).astype(jnp.float32)
    return loss, jnp.mean(exact)


if __name__ == "__main__":
    # Small shapes implied by the forward: outputs (B, S, V), target (B, S)
    B, S, V = 2, 8, 32
    key = jax.random.PRNGKey(0)
    k_out, k_tgt = jax.random.split(key)
    outputs = jax.random.normal(k_out, (B, S, V), dtype=jnp.float32)
    target = jax.random.randint(k_tgt, (B, S), 0, V, dtype=jnp.int32)

    loss, match_rate = parser_loss(outputs, target)
    jax.block_until_ready((loss, match_rate))

    ref_loss, ref_match = _reference(outputs, target)
    assert jnp.allclose(loss, ref_loss, rtol=1e-5, atol=1e-5), (loss, ref_loss)
    assert jnp.allclose(match_rate, ref_match), (match_rate, ref_match)

    print("KERNEL_OK")
</pallas_src>

<mosaic_0001>
module attributes {stable_mosaic.version = 11 : i64} {
  func.func @kernel(%arg0: i32, %arg1: memref<2x8x128xf32, #tpu.memory_space<vmem>>, %arg2: memref<2x8xi32, #tpu.memory_space<vmem>>, %arg3: memref<2x1xf32, #tpu.memory_space<vmem>>, %arg4: memref<2x1xf32, #tpu.memory_space<vmem>>) attributes {dimension_semantics = [#tpu.dimension_semantics<parallel>], iteration_bounds = array<i64: 1>, scalar_prefetch = 0 : i64, scratch_operands = 0 : i64, tpu.core_type = #tpu.core_type<tc>, window_params = [{transform_indices = @transform_0, window_bounds = array<i64: 2, 8, 128>}, {transform_indices = @transform_1, window_bounds = array<i64: 2, 8>}, {transform_indices = @transform_2, window_bounds = array<i64: 2, 1>}, {transform_indices = @transform_3, window_bounds = array<i64: 2, 1>}]} {
    %c0 = arith.constant 0 : index
    %c0_0 = arith.constant 0 : index
    %c0_1 = arith.constant 0 : index
    %0 = vector.load %arg1[%c0, %c0_0, %c0_1] : memref<2x8x128xf32, #tpu.memory_space<vmem>>, vector<2x8x128xf32>
    %c0_2 = arith.constant 0 : index
    %c0_3 = arith.constant 0 : index
    %1 = vector.load %arg2[%c0_2, %c0_3] : memref<2x8xi32, #tpu.memory_space<vmem>>, vector<2x8xi32>
    %cst = arith.constant dense<0xFF800000> : vector<2x8xf32>
    %2 = vector.multi_reduction <maximumf>, %0, %cst [2] : vector<2x8x128xf32> to vector<2x8xf32>
    %3 = vector.shape_cast %2 : vector<2x8xf32> to vector<2x8x1xf32>
    %4 = vector.broadcast %3 : vector<2x8x1xf32> to vector<2x8x128xf32>
    %5 = arith.subf %0, %4 : vector<2x8x128xf32>
    %6 = math.exp %5 : vector<2x8x128xf32>
    %cst_4 = arith.constant dense<0.000000e+00> : vector<2x8xf32>
    %7 = vector.multi_reduction <add>, %6, %cst_4 [2] : vector<2x8x128xf32> to vector<2x8xf32>
    %8 = vector.shape_cast %7 : vector<2x8xf32> to vector<2x8x1xf32>
    %9 = tpu.iota {dimensions = array<i32: 2>} : vector<2x8x128xi32>
    %10 = vector.shape_cast %1 : vector<2x8xi32> to vector<2x8x1xi32>
    %11 = vector.broadcast %10 : vector<2x8x1xi32> to vector<2x8x128xi32>
    %12 = arith.cmpi eq, %9, %11 : vector<2x8x128xi32>
    %cst_5 = arith.constant 0.000000e+00 : f32
    %13 = vector.broadcast %cst_5 : f32 to vector<2x8x128xf32>
    %14 = arith.select %12, %0, %13 : vector<2x8x128xi1>, vector<2x8x128xf32>
    %cst_6 = arith.constant dense<0.000000e+00> : vector<2x8xf32>
    %15 = vector.multi_reduction <add>, %14, %cst_6 [2] : vector<2x8x128xf32> to vector<2x8xf32>
    %16 = vector.shape_cast %15 : vector<2x8xf32> to vector<2x8x1xf32>
    %17 = arith.subf %16, %3 : vector<2x8x1xf32>
    %18 = math.exp %17 : vector<2x8x1xf32>
    %19 = arith.divf %18, %8 : vector<2x8x1xf32>
    %cst_7 = arith.constant 1.000000e-10 : f32
    %20 = vector.broadcast %cst_7 : f32 to vector<2x8x1xf32>
    %21 = arith.addf %19, %20 : vector<2x8x1xf32>
    %22 = math.log %21 : vector<2x8x1xf32>
    %c2_i32 = arith.constant 2 : i32
    %23 = arith.muli %arg0, %c2_i32 : i32
    %24 = tpu.iota {dimensions = array<i32: 0>} : vector<2x1xi32>
    %25 = vector.broadcast %23 : i32 to vector<2x1xi32>
    %26 = arith.addi %25, %24 : vector<2x1xi32>
    %c2_i32_8 = arith.constant 2 : i32
    %27 = vector.broadcast %c2_i32_8 : i32 to vector<2x1xi32>
    %28 = arith.cmpi slt, %26, %27 : vector<2x1xi32>
    %29 = arith.extui %28 : vector<2x1xi1> to vector<2x1xi32>
    %30 = arith.sitofp %29 : vector<2x1xi32> to vector<2x1xf32>
    %cst_9 = arith.constant dense<0.000000e+00> : vector<2x1xf32>
    %31 = vector.multi_reduction <add>, %22, %cst_9 [1] : vector<2x8x1xf32> to vector<2x1xf32>
    %cst_10 = arith.constant 0.000000e+00 : f32
    %32 = vector.broadcast %cst_10 : f32 to vector<2x1xf32>
    %33 = arith.subf %32, %31 : vector<2x1xf32>
    %34 = arith.mulf %33, %30 : vector<2x1xf32>
    %c0_11 = arith.constant 0 : index
    %c0_12 = arith.constant 0 : index
    %35 = vector.load %arg3[%c0_11, %c0_12] : memref<2x1xf32, #tpu.memory_space<vmem>>, vector<2x1xf32>
    tpu.vector_store %arg3[%c0_11, %c0_12], %34 {strides = array<i32>} : memref<2x1xf32, #tpu.memory_space<vmem>>, vector<2x1xf32>,
    %36 = arith.cmpf oge, %16, %3 : vector<2x8x1xf32>
    %37 = arith.extui %36 : vector<2x8x1xi1> to vector<2x8x1xi32>
    %38 = arith.sitofp %37 : vector<2x8x1xi32> to vector<2x8x1xf32>
    %cst_13 = arith.constant dense<0.000000e+00> : vector<2x1xf32>
    %39 = vector.multi_reduction <add>, %38, %cst_13 [1] : vector<2x8x1xf32> to vector<2x1xf32>
    %cst_14 = arith.constant 7.500000e+00 : f32
    %40 = vector.broadcast %cst_14 : f32 to vector<2x1xf32>
    %41 = arith.cmpf ogt, %39, %40 : vector<2x1xf32>
    %42 = arith.extui %41 : vector<2x1xi1> to vector<2x1xi32>
    %43 = arith.sitofp %42 : vector<2x1xi32> to vector<2x1xf32>
    %44 = arith.mulf %43, %30 : vector<2x1xf32>
    %c0_15 = arith.constant 0 : index
    %c0_16 = arith.constant 0 : index
    %45 = vector.load %arg4[%c0_15, %c0_16] : memref<2x1xf32, #tpu.memory_space<vmem>>, vector<2x1xf32>
    tpu.vector_store %arg4[%c0_15, %c0_16], %44 {strides = array<i32>} : memref<2x1xf32, #tpu.memory_space<vmem>>, vector<2x1xf32>,
    return
  }
  func.func @transform_0(%arg0: i32) -> (i32, i32, i32) {
    %c0_i32 = arith.constant 0 : i32
    %c0_i32_0 = arith.constant 0 : i32
    %c0_i32_1 = arith.constant 0 : i32
    return %arg0, %c0_i32, %c0_i32_0 : i32, i32, i32
  }
  func.func @transform_1(%arg0: i32) -> (i32, i32) {
    %c0_i32 = arith.constant 0 : i32
    %c0_i32_0 = arith.constant 0 : i32
    return %arg0, %c0_i32 : i32, i32
  }
  func.func @transform_2(%arg0: i32) -> (i32, i32) {
    %c0_i32 = arith.constant 0 : i32
    %c0_i32_0 = arith.constant 0 : i32
    return %arg0, %c0_i32 : i32, i32
  }
  func.func @transform_3(%arg0: i32) -> (i32, i32) {
    %c0_i32 = arith.constant 0 : i32
    %c0_i32_0 = arith.constant 0 : i32
    return %arg0, %c0_i32 : i32, i32
  }
}

</mosaic_0001>

<bundles_post_ra>
// kernel: tpu_custom_call.1
= control target key start
LH: loop header
LB: loop body
LE: loop exit
PB: predicated region body
PF: predicated region fallthrough
CT: control target
= control target key end

     0   :  { %9 = vsyncpa [#allocation3], 0  ;;  %s210_s12 = smov [#allocation2]   ;;  %s259_s0 = inlined_call_operand.hbm [shape: f32[2,8,128], index: 0, kind: input, shape index: {}]   ;;  %s260_s1 = inlined_call_operand.vmem [shape: s32[2,8], index: 1, kind: input, shape index: {}]   ;;  %s261_s2 = inlined_call_operand.vmem [shape: f32[2,1], index: 2, kind: output, shape index: {0}]   ;;  %s262_s3 = inlined_call_operand.vmem [shape: f32[2,1], index: 3, kind: output, shape index: {1}]  }
   0x1   :  { %s15_s13 = sshll.u32 %s210_s12, 4  ;;  %s186_s16 = scalar_lea.hbm %s259_s0, 256  ;;  %s16_s13 = int_to_ptr.vmem [resolvable:$true] %s15_s13 }
   0x2   :  { %p187_p0 = scmp.ne.s32.totalorder %s259_s0, %s186_s16  ;;  %p190_p1 = scmp.lt.u32.totalorder %s186_s16, %s259_s0 }
   0x4   :  { %p192_p2 = pnand %p190_p1, %p187_p0 }
   0x6   :  { %195 = shalt.err (!%p192_p2)
}
   0x7   :  { %s196_s21 = scalar_lea.vmem %s16_s13, 256  ;;  %p201_p4 = scmp.lt.s32.totalorder %s16_s13, %s16_s13 }
   0x8   :  { %p197_p3 = scmp.ne.s32.totalorder %s16_s13, %s196_s21  ;;  %p202_p5 = scmp.lt.s32.totalorder %s196_s21, %s196_s21 }
   0xa   :  { %p203_p6 = por %p202_p5, %p201_p4 }
   0xc   :  { %p204_p7 = pnand %p203_p6, %p197_p3 }
   0xe   :  { %207 = shalt.err (!%p204_p7)
}
   0xf   :  { %s211_s22 = smov 128   ;;  %s212_s23 = smov 8  }
  0x10   :  { %21 = dma.hbm_to_vmem [thread:$0]  %s259_s0, 256, %s16_s13, [#allocation3], %s211_s22, %s211_s22, %s212_s23  }
  0x11   :  { %208 = dma.done.wait [#allocation3], 256  }
  0x12   :  { %209 = vsyncadd [#allocation3], 4294967040  ;;  %v44_v0 = vlaneseq  ;;  %v28_v4 = vld [vmem:[#allocation2 + $0x8] sm:$0xff]  ;;  %v29_v5 = vld [vmem:[%s260_s1] sm:$0x3]  ;;  %v213_v23 = vmov 0.0  }
  0x13   :  { %32 = vmax.xlane.f32.xlu0 %v28_v4  ;;  %v27_v7 = vld [vmem:[#allocation2] sm:$0xff]  ;;  %vm115_vm7 = vcmask 1041409   ;;  %vm118_vm8 = vcmask 1024  }
  0x14   :  { %v47_v1 = vshrl.u32 %v44_v0, 7  ;;  %v45_v9 = vand.u32 127, %v44_v0 }
  0x16   :  { %v55_v2 = vsub.s32 1, %v47_v1  ;;  %v48_v3 = vsub.s32 0, %v47_v1  ;;  %vm89_vm4 = vcmp.lt.s32.totalorder %v47_v1, 2 }
  0x17   :  { %30 = vmax.xlane.f32.xlu0 %v27_v7  ;;  %v161_v33 = vsel %vm89_vm4, 1.0, %v213_v23 }
  0x18   :  { %v56_v6 = vrot.slane %v29_v5, %v55_v2  ;;  %v49_v8 = vrot.slane %v29_v5, %v48_v3  ;;  %v107_v36 = vrot.slane %v161_v33, 1 }
  0x1a   :  { %58 = vbcast.lane.b32.xlu1 %v56_v6, 256 }
  0x1e   :  { %51 = vbcast.lane.b32.xlu1 %v49_v8, 256 }
  0x8c   :  { %v59_v10 = vpop.permute.xlu1 %58 }
  0x8d   :  { %vm61_vm0 = vcmp.eq.s32.totalorder %v45_v9, %v59_v10 }
  0x8e   :  { %v63_v11 = vsel %vm61_vm0, %v28_v4, 0.0 }
  0x8f   :  { %66 = vadd.xlane.f32.xlu0 %v63_v11 }
  0x90   :  { %v52_v12 = vpop.permute.xlu1 %51 }
  0x91   :  { %vm60_vm1 = vcmp.eq.s32.totalorder %v45_v9, %v52_v12 }
  0x92   :  { %v62_v13 = vsel %vm60_vm1, %v27_v7, 0.0 }
  0x93   :  { %64 = vadd.xlane.f32.xlu1 %v62_v13 }
  0xa0   :  { %v33_v14 = vpop.xlane.xlu0 %32 }
  0xa1   :  { %v35_v15 = vsub.f32 %v28_v4, %v33_v14 }
  0xa3   :  { %v38_v16 = vmul.f32 1.442695, %v35_v15 }
  0xa4   :  { %v31_v17 = vpop.xlane.xlu0 %30 }
  0xa5   :  { %170 = vpow2.f32 %v38_v16  ;;  %v34_v18 = vsub.f32 %v27_v7, %v31_v17 }
  0xa7   :  { %v36_v19 = vmul.f32 1.442695, %v34_v18 }
  0xa9   :  { %172 = vpow2.f32 %v36_v19 }
  0xaf   :  { %v171_v20 = vpop.eup %170 }
  0xb0   :  { %42 = vadd.xlane.f32.xlu0 %v171_v20 }
  0xb3   :  { %v173_v21 = vpop.eup %172 }
  0xb4   :  { %40 = vadd.xlane.f32.xlu0 %v173_v21 }
 0x11c   :  { %v67_v22 = vpop.xlane.xlu0 %66 }
 0x11d   :  { %vm121_vm2 = vcmp.ge.f32.partialorder %v67_v22, %v33_v14  ;;  %v69_v47 = vsub.f32 %v67_v22, %v33_v14 }
 0x11e   :  { %v163_v24 = vsel %vm121_vm2, 1.0, %v213_v23 }
 0x11f   :  { %v132_v25 = vrot.slane %v163_v24, 4  ;;  %v72_v48 = vmul.f32 1.442695, %v69_v47 }
 0x120   :  { %v65_v26 = vpop.xlane.xlu1 %64 }
 0x121   :  { %v133_v27 = vadd.f32 %v163_v24, %v132_v25  ;;  %vm120_vm3 = vcmp.ge.f32.partialorder %v65_v26, %v31_v17  ;;  %v68_v49 = vsub.f32 %v65_v26, %v31_v17  ;;  %174 = vpow2.f32 %v72_v48 }
 0x122   :  { %v162_v28 = vsel %vm120_vm3, 1.0, %v213_v23 }
 0x123   :  { %v134_v29 = vrot.slane %v133_v27, 2  ;;  %v126_v30 = vrot.slane %v162_v28, 4  ;;  %v70_v50 = vmul.f32 1.442695, %v68_v49 }
 0x125   :  { %v135_v31 = vadd.f32 %v134_v29, %v133_v27  ;;  %v127_v32 = vadd.f32 %v162_v28, %v126_v30 }
 0x127   :  { %v136_v34 = vrot.slane %v135_v31, 1  ;;  %v128_v35 = vrot.slane %v127_v32, 2 }
 0x129   :  { %v137_v37 = vadd.f32 %v136_v34, %v135_v31  ;;  %v129_v38 = vadd.f32 %v128_v35, %v127_v32 }
 0x12b   :  { %vm139_vm5 = vcmp.gt.f32.partialorder %v137_v37, 7.5  ;;  %v130_v39 = vrot.slane %v129_v38, 1  ;;  %v175_v53 = vpop.eup %174 }
 0x12c   :  { %v165_v40 = vsel %vm139_vm5, 1.0, %v213_v23 }
 0x12d   :  { %v145_v41 = vmul.f32 %v165_v40, %v107_v36  ;;  %v131_v42 = vadd.f32 %v130_v39, %v129_v38 }
 0x12f   :  { %vm138_vm6 = vcmp.gt.f32.partialorder %v131_v42, 7.5  ;;  %v148_v44 = vrot.slane %v145_v41, 7 }
 0x130   :  { %v164_v43 = vsel %vm138_vm6, 1.0, %v213_v23 }
 0x131   :  { %v144_v45 = vmul.f32 %v164_v43, %v161_v33 }
 0x133   :  { %v149_v46 = vsel %vm115_vm7, %v148_v44, %v144_v45 }
 0x134   :  { %151 = vst.msk [vmem:[%s262_s3] sm:$0x3] %vm118_vm8, %v149_v46 }
 0x13d   :  { %v43_v51 = vpop.xlane.xlu0 %42 }
 0x13e   :  { %176 = vrcp.f32 %v43_v51 }
 0x13f   :  { %178 = vpow2.f32 %v70_v50 }
 0x141   :  { %v41_v52 = vpop.xlane.xlu0 %40 }
 0x142   :  { %180 = vrcp.f32 %v41_v52 }
 0x148   :  { %v177_v54 = vpop.eup %176 }
 0x149   :  { %v77_v55 = vmul.f32 %v177_v54, %v175_v53  ;;  %v179_v56 = vpop.eup %178 }
 0x14b   :  { %v79_v57 = vadd.f32 1e-10, %v77_v55 }
 0x14c   :  { %v181_v58 = vpop.eup %180 }
 0x14d   :  { %182 = vlog2.f32 %v79_v57  ;;  %v75_v59 = vmul.f32 %v181_v58, %v179_v56 }
 0x14f   :  { %v78_v60 = vadd.f32 1e-10, %v75_v59 }
 0x151   :  { %184 = vlog2.f32 %v78_v60 }
 0x157   :  { %v183_v61 = vpop.eup %182 }
 0x158   :  { %v83_v62 = vmul.f32 0.6931472, %v183_v61 }
 0x15a   :  { %v98_v63 = vrot.slane %v83_v62, 4 }
 0x15b   :  { %v185_v0 = vpop.eup %184 }
 0x15c   :  { %v99_v1 = vadd.f32 %v98_v63, %v83_v62  ;;  %v81_v2 = vmul.f32 0.6931472, %v185_v0 }
 0x15e   :  { %v100_v3 = vrot.slane %v99_v1, 2  ;;  %v92_v4 = vrot.slane %v81_v2, 4 }
 0x160   :  { %v101_v5 = vadd.f32 %v100_v3, %v99_v1  ;;  %v93_v6 = vadd.f32 %v92_v4, %v81_v2 }
 0x162   :  { %v102_v7 = vrot.slane %v101_v5, 1  ;;  %v94_v8 = vrot.slane %v93_v6, 2 }
 0x164   :  { %v103_v9 = vadd.f32 %v102_v7, %v101_v5  ;;  %v95_v10 = vadd.f32 %v94_v8, %v93_v6 }
 0x166   :  { %v105_v11 = vsub.f32 0.0, %v103_v9  ;;  %v96_v12 = vrot.slane %v95_v10, 1 }
 0x168   :  { %v111_v13 = vmul.f32 %v107_v36, %v105_v11  ;;  %v97_v14 = vadd.f32 %v96_v12, %v95_v10 }
 0x16a   :  { %v104_v15 = vsub.f32 0.0, %v97_v14  ;;  %v114_v16 = vrot.slane %v111_v13, 7 }
 0x16c   :  { %v110_v17 = vmul.f32 %v161_v33, %v104_v15 }
 0x16e   :  { %v116_v18 = vsel %vm115_vm7, %v114_v16, %v110_v17 }
 0x16f   :  { %119 = vst.msk [vmem:[%s261_s2] sm:$0x3] %vm118_vm8, %v116_v18 }
 0x170   :  { %160 = vsyncpa [#allocation3], 1 }

</bundles_post_ra>
